<compile_context>
chip_gen: v7x
topology: tpu7x:2x2x1
jax: 0.10.0
libtpu: 0.0.40
codegen_flags: <defaults>
</compile_context>

<pallas_src>
import jax
import jax.numpy as jnp
from jax.experimental import pallas as pl
from jax.experimental.pallas import tpu as pltpu

GRAPH_IN = 32     # graph_data feature dim (synthetic)
SEQ_IN = 32       # sequence_data feature dim (synthetic)
GRAPH_OUT = 100   # graph_model.linear.out_features
SEQ_OUT = 100     # sequence_model.fc.out_features
FUSED = GRAPH_OUT + SEQ_OUT   # 200 == fusion_linear.in_features


def _round_up(x, m):
    return ((x + m - 1) // m) * m


def fused_affine_kernel(g_ref, s_ref, wg_ref, ws_ref, b_ref, o_ref):
    """sigmoid(wg_row @ g^T + ws_row @ s^T + b) as one lane-dense (1, TB) row.

    g_ref, s_ref : (TB, 32) bf16   streamed input tiles (dominant HBM traffic)
    wg_ref/ws_ref: (1, 32)  bf16   collapsed effective weight rows
    b_ref        : (1, 1)   f32    collapsed effective bias
    o_ref        : (1, TB)  f32    probabilities for this batch tile
    """
    # Contract both last dims (== w_row @ x.T): batch lands on the lane axis,
    # f32 accumulation on the MXU (which has full slack after the collapse).
    dn = (((1,), (1,)), ((), ()))
    acc = jax.lax.dot_general(wg_ref[...], g_ref[...], dn,
                              preferred_element_type=jnp.float32)
    acc = acc + jax.lax.dot_general(ws_ref[...], s_ref[...], dn,
                                    preferred_element_type=jnp.float32)
    # (1,1) bias broadcasts across lanes; sigmoid on the EUP in f32.
    o_ref[...] = jax.nn.sigmoid(acc + b_ref[...])


def collapse_params(params):
    """Fold graph_model.linear, sequence_model.fc and fusion_linear into one
    equivalent affine map. Do this once; amortized across forward calls."""
    wf = params["wf"]                                   # (200, 1)
    wf_g, wf_s = wf[:GRAPH_OUT], wf[GRAPH_OUT:]         # (100,1), (100,1)
    wg_row = (params["wg"] @ wf_g).reshape(1, GRAPH_IN).astype(jnp.bfloat16)
    ws_row = (params["ws"] @ wf_s).reshape(1, SEQ_IN).astype(jnp.bfloat16)
    b_eff = (params["bg"] @ wf_g + params["bs"] @ wf_s + params["bf"])
    return {"wg_row": wg_row, "ws_row": ws_row,
            "b_eff": b_eff.reshape(1, 1).astype(jnp.float32)}


def fusion_forward(graph_data, sequence_data, eff, *, tile_b=2048):
    """Batched forward. tile_b must be a multiple of 128 (lane-dense output
    blocks when the grid has more than one step)."""
    assert tile_b % 128 == 0
    B = graph_data.shape[0]

    # Tile size: full (8-padded) batch if it is small, else tile_b.
    tb = min(tile_b, _round_up(B, 8))
    b_pad = tb * pl.cdiv(B, tb)

    # bf16 halves the bytes of the dominant HBM stream. For peak efficiency the
    # caller should already hold the activations in bf16 (the cast is a no-op
    # then); the f32->bf16 cast here costs one extra pass otherwise.
    g = graph_data.astype(jnp.bfloat16)
    s = sequence_data.astype(jnp.bfloat16)
    if b_pad != B:
        g = jnp.pad(g, ((0, b_pad - B), (0, 0)))
        s = jnp.pad(s, ((0, b_pad - B), (0, 0)))

    out = pl.pallas_call(
        fused_affine_kernel,
        out_shape=jax.ShapeDtypeStruct((1, b_pad), jnp.float32),
        grid=(b_pad // tb,),
        in_specs=[
            pl.BlockSpec((tb, GRAPH_IN), lambda i: (i, 0)),   # graph tile
            pl.BlockSpec((tb, SEQ_IN), lambda i: (i, 0)),     # sequence tile
            pl.BlockSpec((1, GRAPH_IN), lambda i: (0, 0)),    # wg_eff row
            pl.BlockSpec((1, SEQ_IN), lambda i: (0, 0)),      # ws_eff row
            pl.BlockSpec((1, 1), lambda i: (0, 0)),           # b_eff
        ],
        out_specs=pl.BlockSpec((1, tb), lambda i: (0, i)),    # lane-dense row
        compiler_params=pltpu.CompilerParams(
            dimension_semantics=("parallel",)),               # v7x: 2 TCs
    )(g, s, eff["wg_row"], eff["ws_row"], eff["b_eff"])
    return out[0, :B].reshape(B, 1)


def init_params(key):
    """Deterministic PyTorch-style Linear init (uniform +-1/sqrt(fan_in))."""
    ks = jax.random.split(key, 6)

    def lin(kw, kb, fan_in, fan_out):
        bound = 1.0 / jnp.sqrt(float(fan_in))
        w = jax.random.uniform(kw, (fan_in, fan_out), jnp.float32, -bound, bound)
        b = jax.random.uniform(kb, (fan_out,), jnp.float32, -bound, bound)
        return w, b

    wg, bg = lin(ks[0], ks[1], GRAPH_IN, GRAPH_OUT)   # graph_model.linear
    ws, bs = lin(ks[2], ks[3], SEQ_IN, SEQ_OUT)       # sequence_model.fc
    wf, bf = lin(ks[4], ks[5], FUSED, 1)              # fusion_linear
    return {"wg": wg, "bg": bg, "ws": ws, "bs": bs, "wf": wf, "bf": bf}


def reference_forward(graph_data, sequence_data, p):
    """Layered f32 reference mirroring the PyTorch forward exactly."""
    g_emb = graph_data @ p["wg"] + p["bg"]
    s_emb = sequence_data @ p["ws"] + p["bs"]
    combined = jnp.concatenate([g_emb, s_emb], axis=1)
    _ = jax.nn.relu(combined)  # dead code in the original forward
    return jax.nn.sigmoid(combined @ p["wf"] + p["bf"])


if __name__ == "__main__":
    key = jax.random.PRNGKey(0)
    k_params, k_g, k_s = jax.random.split(key, 3)
    params = init_params(k_params)
    eff = collapse_params(params)   # one-time affine collapse

    # Small demo batch (single tile).
    B = 8
    graph_data = jax.random.normal(k_g, (B, GRAPH_IN), jnp.float32)
    sequence_data = jax.random.normal(k_s, (B, SEQ_IN), jnp.float32)

    out = fusion_forward(graph_data, sequence_data, eff)
    out = jax.block_until_ready(out)
    ref = reference_forward(graph_data, sequence_data, params)
    assert out.shape == (B, 1)
    # bf16 input/weight streaming -> relaxed tolerance vs. the f32 reference.
    assert jnp.allclose(out, ref, atol=1e-2, rtol=1e-2)

    # Larger, non-multiple-of-tile batch exercising the multi-step grid
    # (padding + "parallel" batch axis + lane-dense (1, 128) output blocks).
    B2 = 300
    g2 = jax.random.normal(jax.random.PRNGKey(1), (B2, GRAPH_IN), jnp.float32)
    s2 = jax.random.normal(jax.random.PRNGKey(2), (B2, SEQ_IN), jnp.float32)
    out2 = jax.block_until_ready(fusion_forward(g2, s2, eff, tile_b=128))
    ref2 = reference_forward(g2, s2, params)
    assert out2.shape == (B2, 1)
    assert jnp.allclose(out2, ref2, atol=1e-2, rtol=1e-2)

    print("KERNEL_OK")
</pallas_src>

<mosaic_0001>
module attributes {stable_mosaic.version = 11 : i64} {
  func.func @fused_affine_kernel(%arg0: i32, %arg1: memref<8x32xbf16, #tpu.memory_space<vmem>>, %arg2: memref<8x32xbf16, #tpu.memory_space<vmem>>, %arg3: memref<1x32xbf16, #tpu.memory_space<vmem>>, %arg4: memref<1x32xbf16, #tpu.memory_space<vmem>>, %arg5: memref<1x1xf32, #tpu.memory_space<vmem>>, %arg6: memref<1x8xf32, #tpu.memory_space<vmem>>) attributes {dimension_semantics = [#tpu.dimension_semantics<parallel>], iteration_bounds = array<i64: 1>, scalar_prefetch = 0 : i64, scratch_operands = 0 : i64, tpu.core_type = #tpu.core_type<tc>, window_params = [{transform_indices = @transform_0, window_bounds = array<i64: 8, 32>}, {transform_indices = @transform_1, window_bounds = array<i64: 8, 32>}, {pipeline_mode = #tpu.pipeline_mode<synchronous>, transform_indices = @transform_2, window_bounds = array<i64: 1, 32>}, {pipeline_mode = #tpu.pipeline_mode<synchronous>, transform_indices = @transform_3, window_bounds = array<i64: 1, 32>}, {pipeline_mode = #tpu.pipeline_mode<synchronous>, transform_indices = @transform_4, window_bounds = array<i64: 1, 1>}, {transform_indices = @transform_5, window_bounds = array<i64: 1, 8>}]} {
    %c0 = arith.constant 0 : index
    %c0_0 = arith.constant 0 : index
    %0 = vector.load %arg3[%c0, %c0_0] : memref<1x32xbf16, #tpu.memory_space<vmem>>, vector<1x32xbf16>
    %c0_1 = arith.constant 0 : index
    %c0_2 = arith.constant 0 : index
    %1 = vector.load %arg1[%c0_1, %c0_2] : memref<8x32xbf16, #tpu.memory_space<vmem>>, vector<8x32xbf16>
    %cst = arith.constant dense<0.000000e+00> : vector<1x8xf32>
    %2 = tpu.matmul %0, %1, %cst {dimension_numbers = #tpu.dot_dimension_numbers<[1], [1], [0], [0], [0, 0, 1, 0], [], []>} : vector<1x32xbf16>, vector<8x32xbf16>, vector<1x8xf32> -> vector<1x8xf32>
    %c0_3 = arith.constant 0 : index
    %c0_4 = arith.constant 0 : index
    %3 = vector.load %arg4[%c0_3, %c0_4] : memref<1x32xbf16, #tpu.memory_space<vmem>>, vector<1x32xbf16>
    %c0_5 = arith.constant 0 : index
    %c0_6 = arith.constant 0 : index
    %4 = vector.load %arg2[%c0_5, %c0_6] : memref<8x32xbf16, #tpu.memory_space<vmem>>, vector<8x32xbf16>
    %cst_7 = arith.constant dense<0.000000e+00> : vector<1x8xf32>
    %5 = tpu.matmul %3, %4, %cst_7 {dimension_numbers = #tpu.dot_dimension_numbers<[1], [1], [0], [0], [0, 0, 1, 0], [], []>} : vector<1x32xbf16>, vector<8x32xbf16>, vector<1x8xf32> -> vector<1x8xf32>
    %6 = arith.addf %2, %5 : vector<1x8xf32>
    %c0_8 = arith.constant 0 : index
    %c0_9 = arith.constant 0 : index
    %7 = vector.load %arg5[%c0_8, %c0_9] : memref<1x1xf32, #tpu.memory_space<vmem>>, vector<1x1xf32>
    %8 = vector.broadcast %7 : vector<1x1xf32> to vector<1x8xf32>
    %9 = arith.addf %6, %8 : vector<1x8xf32>
    %10 = arith.negf %9 : vector<1x8xf32>
    %11 = math.exp %10 : vector<1x8xf32>
    %cst_10 = arith.constant 1.000000e+00 : f32
    %12 = vector.broadcast %cst_10 : f32 to vector<1x8xf32>
    %13 = arith.addf %12, %11 : vector<1x8xf32>
    %14 = arith.divf %12, %13 : vector<1x8xf32>
    %c0_11 = arith.constant 0 : index
    %c0_12 = arith.constant 0 : index
    %15 = vector.load %arg6[%c0_11, %c0_12] : memref<1x8xf32, #tpu.memory_space<vmem>>, vector<1x8xf32>
    tpu.vector_store %arg6[%c0_11, %c0_12], %14 {strides = array<i32>} : memref<1x8xf32, #tpu.memory_space<vmem>>, vector<1x8xf32>,
    return
  }
  func.func @transform_0(%arg0: i32) -> (i32, i32) {
    %c0_i32 = arith.constant 0 : i32
    %c0_i32_0 = arith.constant 0 : i32
    return %arg0, %c0_i32 : i32, i32
  }
  func.func @transform_1(%arg0: i32) -> (i32, i32) {
    %c0_i32 = arith.constant 0 : i32
    %c0_i32_0 = arith.constant 0 : i32
    return %arg0, %c0_i32 : i32, i32
  }
  func.func @transform_2(%arg0: i32) -> (i32, i32) {
    %c0_i32 = arith.constant 0 : i32
    %c0_i32_0 = arith.constant 0 : i32
    %c0_i32_1 = arith.constant 0 : i32
    return %c0_i32, %c0_i32_0 : i32, i32
  }
  func.func @transform_3(%arg0: i32) -> (i32, i32) {
    %c0_i32 = arith.constant 0 : i32
    %c0_i32_0 = arith.constant 0 : i32
    %c0_i32_1 = arith.constant 0 : i32
    return %c0_i32, %c0_i32_0 : i32, i32
  }
  func.func @transform_4(%arg0: i32) -> (i32, i32) {
    %c0_i32 = arith.constant 0 : i32
    %c0_i32_0 = arith.constant 0 : i32
    %c0_i32_1 = arith.constant 0 : i32
    return %c0_i32, %c0_i32_0 : i32, i32
  }
  func.func @transform_5(%arg0: i32) -> (i32, i32) {
    %c0_i32 = arith.constant 0 : i32
    %c0_i32_0 = arith.constant 0 : i32
    return %c0_i32, %arg0 : i32, i32
  }
}

</mosaic_0001>

<bundles_post_ra>
// kernel: tpu_custom_call.1
= control target key start
LH: loop header
LB: loop body
LE: loop exit
PB: predicated region body
PF: predicated region fallthrough
CT: control target
= control target key end

     0   :  { %s315_s0 = inlined_call_operand.hbm [shape: bf16[8,32], index: 0, kind: input, shape index: {}]   ;;  %s316_s1 = inlined_call_operand.vmem [shape: bf16[8,32], index: 1, kind: input, shape index: {}]   ;;  %s317_s2 = inlined_call_operand.vmem [shape: bf16[1,32], index: 2, kind: input, shape index: {}]   ;;  %s318_s3 = inlined_call_operand.vmem [shape: bf16[1,32], index: 3, kind: input, shape index: {}]   ;;  %s319_s4 = inlined_call_operand.<no memory space> [shape: f32[1,1], index: 4, kind: input, shape index: {}]   ;;  %s320_s5 = inlined_call_operand.hbm [shape: f32[1,8], index: 5, kind: output, shape index: {}]  }
   0x1   :  { %v10_v0 = vstv %s319_s4 }
   0x2   :  { %11 = vst [vmem:[#allocation2] sm:$0x1] %v10_v0 }
   0x3   :  { %12 = vsyncpa [#allocation4], 0 }
   0x4   :  { %13 = vsyncpa [#allocation5], 0  ;;  %s244_s20 = smov [#allocation3]   ;;  %s196_s24 = scalar_lea.hbm %s315_s0, 64 }
   0x5   :  { %s20_s21 = sshll.u32 %s244_s20, 4  ;;  %p197_p0 = scmp.ne.s32.totalorder %s315_s0, %s196_s24  ;;  %s21_s21 = int_to_ptr.vmem [resolvable:$true] %s20_s21 }
   0x6   :  { %p200_p1 = scmp.lt.u32.totalorder %s196_s24, %s315_s0 }
   0x8   :  { %p202_p2 = pnand %p200_p1, %p197_p0 }
   0xa   :  { %205 = shalt.err (!%p202_p2)
}
   0xb   :  { %s206_s4 = scalar_lea.vmem %s21_s21, 64  ;;  %p211_p4 = scmp.lt.s32.totalorder %s21_s21, %s21_s21 }
   0xc   :  { %p207_p3 = scmp.ne.s32.totalorder %s21_s21, %s206_s4  ;;  %p212_p5 = scmp.lt.s32.totalorder %s206_s4, %s206_s4 }
   0xe   :  { %p213_p6 = por %p212_p5, %p211_p4 }
  0x10   :  { %p214_p7 = pnand %p213_p6, %p207_p3 }
  0x12   :  { %217 = shalt.err (!%p214_p7)
}
  0x13   :  { %23 = dma.hbm_to_vmem [thread:$0]  %s315_s0, 64, %s21_s21, [#allocation4]  }
  0x14   :  { %240 = dma.done.wait [#allocation4], 64  }
  0x15   :  { %241 = vsyncadd [#allocation4], 4294967232  ;;  %v245_v1 = vmov 0.0   ;;  %vm246_vm0 = vmmov 0   ;;  %v247_v2 = vmov 0   ;;  %vm40_vm1 = vcmask 261120  }
  0x16   :  { %174 = vmatprep.subr.bf16.mxu0 %v245_v1  ;;  %180 = vmatprep.subr.bf16.mxu1 %v245_v1  ;;  %v39_v3 = vld [vmem:[%s316_s1] sm:$0xf]  ;;  %v139_v10 = vlaneseq  ;;  %s248_s1 = smov [#allocation6]   ;;  %vm150_vm2 = vcmask 57344  }
  0x17   :  { %176 = vmatprep.mubr.msk.bf16.mxu0 %vm246_vm0, %v245_v1  ;;  %182 = vmatprep.mubr.msk.bf16.mxu1 %vm246_vm0, %v245_v1  ;;  %v37_v4 = vld [vmem:[#allocation3] sm:$0xf]  ;;  %v45_v5 = vsel %vm40_vm1, %v39_v3, 0  ;;  %v133_v7 = vld [vmem:[#allocation2] sm:$0x1] }
  0x18   :  { %191 = vset.pattern.permute.xlu0 %v247_v2  ;;  %v91_v6 = vsel %vm40_vm1, %v37_v4, 0  ;;  %175 = vmatpush3.bf16.xpose.msra.mxu0 %v45_v5  ;;  %v38_v8 = vld [vmem:[%s318_s3] sm:$0x1]  ;;  %v140_v11 = vshrl.u32 %v139_v10, 7 }
  0x19   :  { %181 = vmatpush3.bf16.xpose.msra.mxu1 %v91_v6  ;;  %136 = vperm.xlu0 %191, %v133_v7   ;;  %v36_v9 = vld [vmem:[%s317_s2] sm:$0x1]  ;;  %s158_s2 = sshll.u32 %s248_s1, 4  ;;  %s159_s2 = int_to_ptr.vmem [resolvable:$true] %s158_s2 }
  0x1a   :  { %v141_v12 = vsub.s32 0, %v140_v11  ;;  %s218_s3 = scalar_lea.vmem %s159_s2, 16  ;;  %s222_s11 = scalar_lea.vmem %s159_s2, 32 }
  0x1b   :  { %p219_p8 = scmp.ne.s32.totalorder %s159_s2, %s218_s3  ;;  %p223_p9 = scmp.lt.s32.totalorder %s159_s2, %s159_s2 }
  0x1c   :  { %p224_p10 = scmp.lt.s32.totalorder %s222_s11, %s218_s3 }
  0x1e   :  { %p225_p11 = por %p224_p10, %p223_p9 }
  0x1f   :  { %177 = vmatmul.mubr.msk.bf16.vlgmr.msra.gmra.mrb[0].mxu0 %vm40_vm1, %v38_v8 }
  0x20   :  { %183 = vmatmul.mubr.msk.bf16.vlgmr.msra.gmra.mrb[0].mxu1 %vm40_vm1, %v36_v9  ;;  %p226_p12 = pnand %p225_p11, %p219_p8 }
  0x98   :  { %v137_v13 = vpop.permute.xlu0 %136 }
  0x99   :  { %v142_v14 = vrot.slane %v137_v13, %v141_v12 }
  0xf2   :  { %v81_v15 = vpop.f32.mrb[0].mxu0 }
  0xf3   :  { %v127_v16 = vpop.f32.mrb[0].mxu1  ;;  %v178_v18 = vpop.f32.mrb[1].mxu0 }
  0xf4   :  { %v128_v17 = vadd.f32 %v127_v16, %v81_v15  ;;  %v184_v19 = vpop.f32.mrb[1].mxu1  ;;  %v84_v20 = vpop.f32.mrb[2].mxu0 }
  0xf5   :  { %v130_v21 = vpop.f32.mrb[2].mxu1  ;;  %v179_v23 = vpop.f32.mrb[3].mxu0 }
  0xf6   :  { %v143_v22 = vadd.f32 %v142_v14, %v128_v17  ;;  %v185_v24 = vpop.f32.mrb[3].mxu1 }
  0xf8   :  { %v169_v25 = vmul.f32 -1.442695, %v143_v22 }
  0xfa   :  { %192 = vpow2.f32 %v169_v25 }
 0x104   :  { %v193_v26 = vpop.eup %192 }
 0x105   :  { %v147_v27 = vadd.f32 1.0, %v193_v26 }
 0x107   :  { %194 = vrcp.f32 %v147_v27 }
 0x111   :  { %v195_v28 = vpop.eup %194 }
 0x112   :  { %151 = vst.msk [vmem:[#allocation6] sm:$0x1] %vm150_vm2, %v195_v28 }
 0x113   :  { %229 = shalt.err (!%p226_p12)
}
 0x114   :  { %s230_s14 = scalar_lea.hbm %s320_s5, 16 }
 0x115   :  { %p231_p13 = scmp.ne.s32.totalorder %s320_s5, %s230_s14  ;;  %p234_p0 = scmp.lt.u32.totalorder %s230_s14, %s320_s5 }
 0x117   :  { %p236_p1 = pnand %p234_p0, %p231_p13 }
 0x119   :  { %239 = shalt.err (!%p236_p1)
}
 0x11a   :  { %161 = dma.vmem_to_hbm [thread:$0]  %s159_s2, 16, %s320_s5, [#allocation5]  }
 0x11b   :  { %242 = dma.done.wait [#allocation5], 16  }
 0x11c   :  { %243 = vsyncadd [#allocation5], 4294967280 }
 0x11d   :  { %165 = vsyncpa [#allocation4], 1 }
 0x11e   :  { %166 = vsyncpa [#allocation5], 1 }

</bundles_post_ra>
